<compile_context>
chip_gen: v6e
topology: v6e:2x2x1
jax: 0.10.0
libtpu: 0.0.40
codegen_flags: <defaults>
</compile_context>

<pallas_src>
import functools

import jax
import jax.numpy as jnp
from jax import lax
from jax.experimental import pallas as pl
from jax.experimental.pallas import tpu as pltpu


def _mha_kernel(x_ref, wqkv_ref, bqkv_ref, wo_ref, bo_ref, o_ref,
                k_scr, v_scr, q_scr, ctx_scr, *, n_heads, head_dim, q_tile):
    H, hd, tq = n_heads, head_dim, q_tile
    D = H * hd
    qt = pl.program_id(1)

    # ---- Fused Q|K|V projection for this tile's rows (one MXU pass).
    #      Causality: query tile qt only needs K/V rows of tiles 0..qt, and
    #      tiles 0..qt-1 were projected in earlier (sequential) grid steps.
    x_tile = x_ref[0]                                                  # (tq, Din) bf16
    qkv = jnp.dot(x_tile, wqkv_ref[...],
                  preferred_element_type=jnp.float32) + bqkv_ref[...]  # (tq, 3D) f32

    # Head split: static lane slices, written once per tile into persistent
    # scratch (amortized over every later query tile that re-reads them).
    for h in range(H):
        q_scr[h] = qkv[:, h * hd:(h + 1) * hd].astype(jnp.bfloat16)
        k_scr[qt, h] = qkv[:, D + h * hd:D + (h + 1) * hd].astype(jnp.bfloat16)
        v_scr[qt, h] = qkv[:, 2 * D + h * hd:2 * D + (h + 1) * hd].astype(jnp.bfloat16)

    qh = q_scr[...]                                                    # (H, tq, hd) bf16

    # ---- Diagonal KV tile (the only one needing the causal mask). Every query
    #      row attends to itself, so the running max starts finite.
    kh = k_scr[qt]                                                     # (H, tq, hd) bf16
    vh = v_scr[qt]
    s = jnp.einsum('hqd,hkd->hqk', qh, kh,
                   preferred_element_type=jnp.float32)                 # (H, tq, tq) f32
    row = lax.broadcasted_iota(jnp.int32, (tq, tq), 0)
    col = lax.broadcasted_iota(jnp.int32, (tq, tq), 1)
    s = jnp.where((col > row)[None], -1e30, s)                         # head-invariant mask

    m = jnp.max(s, axis=-1, keepdims=True)                             # (H, tq, 1) f32
    p = jnp.exp(s - m)
    l = jnp.sum(p, axis=-1, keepdims=True)
    acc = jnp.einsum('hqk,hkd->hqd', p.astype(jnp.bfloat16), vh,
                     preferred_element_type=jnp.float32)               # (H, tq, hd) f32

    # ---- Earlier KV tiles (fully unmasked): flash-style online softmax.
    def kv_step(kv_i, carry):
        m_p, l_p, acc_p = carry
        kh = k_scr[kv_i]                                               # (H, tq, hd) bf16
        vh = v_scr[kv_i]
        s = jnp.einsum('hqd,hkd->hqk', qh, kh,
                       preferred_element_type=jnp.float32)
        m_n = jnp.maximum(m_p, jnp.max(s, axis=-1, keepdims=True))
        alpha = jnp.exp(m_p - m_n)
        p = jnp.exp(s - m_n)
        l_n = alpha * l_p + jnp.sum(p, axis=-1, keepdims=True)
        acc_n = alpha * acc_p + jnp.einsum('hqk,hkd->hqd',
                                           p.astype(jnp.bfloat16), vh,
                                           preferred_element_type=jnp.float32)
        return m_n, l_n, acc_n

    m, l, acc = lax.fori_loop(0, qt, kv_step, (m, l, acc))

    # ---- Normalize (EUP reciprocal), reassemble heads, output projection.
    ctx = acc * pl.reciprocal(l, approx=True)                          # (H, tq, hd) f32
    # TODO(synk): attention-weight dropout omitted (eval-mode / identity).
    for h in range(H):
        ctx_scr[:, h * hd:(h + 1) * hd] = ctx[h].astype(jnp.bfloat16)

    out = jnp.dot(ctx_scr[...], wo_ref[...],
                  preferred_element_type=jnp.float32) + bo_ref[...]    # (tq, D) f32
    o_ref[0] = out.astype(o_ref.dtype)


def multi_head_attention(x, params, n_heads, *, q_tile=256):
    """x: (B, T, in_dim) float32. params: dict of pre-transposed f32 weights/biases.

    q_tile sweep guidance: 256–512 on v5e/v6e (128 MiB VMEM), 128–256 on v7x
    (64 MiB VMEM).  T must be divisible by the chosen tile.
    """
    B, T, Din = x.shape
    D = params["wq"].shape[1]
    hd = D // n_heads
    scale = 1.0 / (hd ** 0.5)

    tq = min(q_tile, T)
    assert T % tq == 0, "context_length must be divisible by the query tile"
    n_qt = T // tq

    # Host-side prep: fold softmax scale into the Q columns, fuse Q|K|V weights
    # into one operand, cast matmul operands to bf16 (biases stay f32 — they are
    # added to f32 accumulators).
    wqkv = jnp.concatenate(
        [params["wq"] * scale, params["wk"], params["wv"]], axis=1).astype(jnp.bfloat16)
    bqkv = jnp.concatenate(
        [params["bq"] * scale, params["bk"], params["bv"]], axis=1)          # (1, 3D) f32
    wo = params["wo"].astype(jnp.bfloat16)
    bo = params["bo"]
    x_bf = x.astype(jnp.bfloat16)

    kernel = functools.partial(_mha_kernel, n_heads=n_heads, head_dim=hd, q_tile=tq)
    const = lambda shape: pl.BlockSpec(shape, lambda b, qi: (0, 0))  # grid-invariant

    return pl.pallas_call(
        kernel,
        out_shape=jax.ShapeDtypeStruct((B, T, D), x.dtype),
        grid_spec=pltpu.PrefetchScalarGridSpec(
            num_scalar_prefetch=0,
            grid=(B, n_qt),
            in_specs=[
                pl.BlockSpec((1, tq, Din), lambda b, qi: (b, qi, 0)),  # x tile (Q rows == new K/V rows)
                const((Din, 3 * D)),   # wqkv (Q-scale folded, bf16)
                const((1, 3 * D)),     # bqkv (f32)
                const((D, D)),         # wo   (bf16)
                const((1, D)),         # bo   (f32)
            ],
            out_specs=pl.BlockSpec((1, tq, D), lambda b, qi: (b, qi, 0)),
            scratch_shapes=[
                pltpu.VMEM((n_qt, n_heads, tq, hd), jnp.bfloat16),  # K heads (built incrementally)
                pltpu.VMEM((n_qt, n_heads, tq, hd), jnp.bfloat16),  # V heads
                pltpu.VMEM((n_heads, tq, hd), jnp.bfloat16),        # Q heads (current tile)
                pltpu.VMEM((tq, D), jnp.bfloat16),                  # context (head reassembly)
            ],
        ),
        compiler_params=pltpu.CompilerParams(
            dimension_semantics=("parallel", "arbitrary"),
            vmem_limit_bytes=40 * 1024 * 1024,
        ),
    )(x_bf, wqkv, bqkv, wo, bo)


def _reference(x, params, n_heads):
    """Pure-JAX f32 reference mirroring the PyTorch forward (eval mode, no dropout)."""
    B, T, _ = x.shape
    out_dim = params["wq"].shape[1]
    head_dim = out_dim // n_heads

    q = x @ params["wq"] + params["bq"]
    k = x @ params["wk"] + params["bk"]
    v = x @ params["wv"] + params["bv"]

    def split(t):  # (B, T, out_dim) -> (B, H, T, hd)
        return t.reshape(B, T, n_heads, head_dim).transpose(0, 2, 1, 3)

    q, k, v = split(q), split(k), split(v)
    scores = q @ jnp.swapaxes(k, -2, -1)
    mask = jnp.triu(jnp.ones((T, T), bool), k=1)
    scores = jnp.where(mask, -jnp.inf, scores)
    attn = jax.nn.softmax(scores / head_dim ** 0.5, axis=-1)
    ctx = (attn @ v).transpose(0, 2, 1, 3).reshape(B, T, out_dim)
    return ctx @ params["wo"] + params["bo"]


if __name__ == "__main__":
    # Small shapes consistent with the module's forward.
    B, T, in_dim, out_dim, n_heads = 2, 8, 32, 32, 4

    key = jax.random.PRNGKey(0)
    keys = jax.random.split(key, 10)

    def lin(kw, kb, fan_in, fan_out):
        w = jax.random.normal(kw, (fan_in, fan_out), jnp.float32) * 0.1
        b = jax.random.normal(kb, (1, fan_out), jnp.float32) * 0.1
        return w, b

    wq, bq = lin(keys[0], keys[1], in_dim, out_dim)
    wk, bk = lin(keys[2], keys[3], in_dim, out_dim)
    wv, bv = lin(keys[4], keys[5], in_dim, out_dim)
    wo, bo = lin(keys[6], keys[7], out_dim, out_dim)
    params = dict(wq=wq, bq=bq, wk=wk, bk=bk, wv=wv, bv=bv, wo=wo, bo=bo)

    x = jax.random.normal(keys[8], (B, T, in_dim), jnp.float32)

    out = multi_head_attention(x, params, n_heads)
    out = jax.block_until_ready(out)

    ref = _reference(x, params, n_heads)
    assert out.shape == (B, T, out_dim)

    # Kernel uses bf16 MXU operands (f32 accumulation) vs. the pure-f32 reference,
    # so compare at bf16-level tolerance.
    max_err = float(jnp.max(jnp.abs(out - ref)))
    assert max_err < 5e-2, f"mismatch vs reference (max abs err {max_err:.4g})"

    print("KERNEL_OK")
</pallas_src>

<mosaic_0001>
module attributes {stable_mosaic.version = 11 : i64} {
  func.func @_mha_kernel(%arg0: i32, %arg1: i32, %arg2: memref<1x8x32xbf16, #tpu.memory_space<vmem>>, %arg3: memref<32x96xbf16, #tpu.memory_space<vmem>>, %arg4: memref<1x96xf32, #tpu.memory_space<vmem>>, %arg5: memref<32x32xbf16, #tpu.memory_space<vmem>>, %arg6: memref<1x32xf32, #tpu.memory_space<vmem>>, %arg7: memref<1x8x32xf32, #tpu.memory_space<vmem>>, %arg8: memref<1x4x8x8xbf16, #tpu.memory_space<vmem>>, %arg9: memref<1x4x8x8xbf16, #tpu.memory_space<vmem>>, %arg10: memref<4x8x8xbf16, #tpu.memory_space<vmem>>, %arg11: memref<8x32xbf16, #tpu.memory_space<vmem>>) attributes {dimension_semantics = [#tpu.dimension_semantics<parallel>, #tpu.dimension_semantics<arbitrary>], iteration_bounds = array<i64: 2, 1>, scalar_prefetch = 0 : i64, scratch_operands = 4 : i64, tpu.core_type = #tpu.core_type<tc>, window_params = [{transform_indices = @transform_0, window_bounds = array<i64: 1, 8, 32>}, {pipeline_mode = #tpu.pipeline_mode<synchronous>, transform_indices = @transform_1, window_bounds = array<i64: 32, 96>}, {pipeline_mode = #tpu.pipeline_mode<synchronous>, transform_indices = @transform_2, window_bounds = array<i64: 1, 96>}, {pipeline_mode = #tpu.pipeline_mode<synchronous>, transform_indices = @transform_3, window_bounds = array<i64: 32, 32>}, {pipeline_mode = #tpu.pipeline_mode<synchronous>, transform_indices = @transform_4, window_bounds = array<i64: 1, 32>}, {transform_indices = @transform_5, window_bounds = array<i64: 1, 8, 32>}]} {
    %c0 = arith.constant 0 : index
    %c0_0 = arith.constant 0 : index
    %c0_1 = arith.constant 0 : index
    %0 = vector.load %arg2[%c0, %c0_0, %c0_1] : memref<1x8x32xbf16, #tpu.memory_space<vmem>>, vector<1x8x32xbf16>
    %1 = vector.shape_cast %0 : vector<1x8x32xbf16> to vector<8x32xbf16>
    %c0_2 = arith.constant 0 : index
    %c0_3 = arith.constant 0 : index
    %2 = vector.load %arg3[%c0_2, %c0_3] : memref<32x96xbf16, #tpu.memory_space<vmem>>, vector<32x96xbf16>
    %cst = arith.constant dense<0.000000e+00> : vector<8x96xf32>
    %3 = tpu.matmul %1, %2, %cst {dimension_numbers = #tpu.dot_dimension_numbers<[1], [0], [0], [1], [0, 0, 1, 1], [], []>} : vector<8x32xbf16>, vector<32x96xbf16>, vector<8x96xf32> -> vector<8x96xf32>
    %c0_4 = arith.constant 0 : index
    %c0_5 = arith.constant 0 : index
    %4 = vector.load %arg4[%c0_4, %c0_5] : memref<1x96xf32, #tpu.memory_space<vmem>>, vector<1x96xf32>
    %5 = vector.broadcast %4 : vector<1x96xf32> to vector<8x96xf32>
    %6 = arith.addf %3, %5 : vector<8x96xf32>
    %7 = vector.extract_strided_slice %6 {offsets = [0, 0], sizes = [8, 8], strides = [1, 1]} : vector<8x96xf32> to vector<8x8xf32>
    %8 = arith.truncf %7 : vector<8x8xf32> to vector<8x8xbf16>
    %c0_6 = arith.constant 0 : index
    %c0_7 = arith.constant 0 : index
    %c0_8 = arith.constant 0 : index
    %9 = vector.load %arg10[%c0_6, %c0_7, %c0_8] : memref<4x8x8xbf16, #tpu.memory_space<vmem>>, vector<1x8x8xbf16>
    %10 = vector.shape_cast %9 : vector<1x8x8xbf16> to vector<8x8xbf16>
    %11 = vector.shape_cast %8 : vector<8x8xbf16> to vector<1x8x8xbf16>
    tpu.vector_store %arg10[%c0_6, %c0_7, %c0_8], %11 {strides = array<i32>} : memref<4x8x8xbf16, #tpu.memory_space<vmem>>, vector<1x8x8xbf16>,
    %12 = vector.extract_strided_slice %6 {offsets = [0, 32], sizes = [8, 8], strides = [1, 1]} : vector<8x96xf32> to vector<8x8xf32>
    %13 = arith.truncf %12 : vector<8x8xf32> to vector<8x8xbf16>
    %14 = arith.index_cast %arg1 : i32 to index
    %c0_9 = arith.constant 0 : index
    %c0_10 = arith.constant 0 : index
    %c0_11 = arith.constant 0 : index
    %15 = vector.load %arg8[%14, %c0_9, %c0_10, %c0_11] : memref<1x4x8x8xbf16, #tpu.memory_space<vmem>>, vector<1x1x8x8xbf16>
    %16 = vector.shape_cast %15 : vector<1x1x8x8xbf16> to vector<8x8xbf16>
    %17 = vector.shape_cast %13 : vector<8x8xbf16> to vector<1x1x8x8xbf16>
    tpu.vector_store %arg8[%14, %c0_9, %c0_10, %c0_11], %17 {strides = array<i32>} : memref<1x4x8x8xbf16, #tpu.memory_space<vmem>>, vector<1x1x8x8xbf16>,
    %18 = vector.extract_strided_slice %6 {offsets = [0, 64], sizes = [8, 8], strides = [1, 1]} : vector<8x96xf32> to vector<8x8xf32>
    %19 = arith.truncf %18 : vector<8x8xf32> to vector<8x8xbf16>
    %20 = arith.index_cast %arg1 : i32 to index
    %c0_12 = arith.constant 0 : index
    %c0_13 = arith.constant 0 : index
    %c0_14 = arith.constant 0 : index
    %21 = vector.load %arg9[%20, %c0_12, %c0_13, %c0_14] : memref<1x4x8x8xbf16, #tpu.memory_space<vmem>>, vector<1x1x8x8xbf16>
    %22 = vector.shape_cast %21 : vector<1x1x8x8xbf16> to vector<8x8xbf16>
    %23 = vector.shape_cast %19 : vector<8x8xbf16> to vector<1x1x8x8xbf16>
    tpu.vector_store %arg9[%20, %c0_12, %c0_13, %c0_14], %23 {strides = array<i32>} : memref<1x4x8x8xbf16, #tpu.memory_space<vmem>>, vector<1x1x8x8xbf16>,
    %24 = vector.extract_strided_slice %6 {offsets = [0, 8], sizes = [8, 8], strides = [1, 1]} : vector<8x96xf32> to vector<8x8xf32>
    %25 = arith.truncf %24 : vector<8x8xf32> to vector<8x8xbf16>
    %c1 = arith.constant 1 : index
    %c0_15 = arith.constant 0 : index
    %c0_16 = arith.constant 0 : index
    %26 = vector.load %arg10[%c1, %c0_15, %c0_16] : memref<4x8x8xbf16, #tpu.memory_space<vmem>>, vector<1x8x8xbf16>
    %27 = vector.shape_cast %26 : vector<1x8x8xbf16> to vector<8x8xbf16>
    %28 = vector.shape_cast %25 : vector<8x8xbf16> to vector<1x8x8xbf16>
    tpu.vector_store %arg10[%c1, %c0_15, %c0_16], %28 {strides = array<i32>} : memref<4x8x8xbf16, #tpu.memory_space<vmem>>, vector<1x8x8xbf16>,
    %29 = vector.extract_strided_slice %6 {offsets = [0, 40], sizes = [8, 8], strides = [1, 1]} : vector<8x96xf32> to vector<8x8xf32>
    %30 = arith.truncf %29 : vector<8x8xf32> to vector<8x8xbf16>
    %31 = arith.index_cast %arg1 : i32 to index
    %c1_17 = arith.constant 1 : index
    %c0_18 = arith.constant 0 : index
    %c0_19 = arith.constant 0 : index
    %32 = vector.load %arg8[%31, %c1_17, %c0_18, %c0_19] : memref<1x4x8x8xbf16, #tpu.memory_space<vmem>>, vector<1x1x8x8xbf16>
    %33 = vector.shape_cast %32 : vector<1x1x8x8xbf16> to vector<8x8xbf16>
    %34 = vector.shape_cast %30 : vector<8x8xbf16> to vector<1x1x8x8xbf16>
    tpu.vector_store %arg8[%31, %c1_17, %c0_18, %c0_19], %34 {strides = array<i32>} : memref<1x4x8x8xbf16, #tpu.memory_space<vmem>>, vector<1x1x8x8xbf16>,
    %35 = vector.extract_strided_slice %6 {offsets = [0, 72], sizes = [8, 8], strides = [1, 1]} : vector<8x96xf32> to vector<8x8xf32>
    %36 = arith.truncf %35 : vector<8x8xf32> to vector<8x8xbf16>
    %37 = arith.index_cast %arg1 : i32 to index
    %c1_20 = arith.constant 1 : index
    %c0_21 = arith.constant 0 : index
    %c0_22 = arith.constant 0 : index
    %38 = vector.load %arg9[%37, %c1_20, %c0_21, %c0_22] : memref<1x4x8x8xbf16, #tpu.memory_space<vmem>>, vector<1x1x8x8xbf16>
    %39 = vector.shape_cast %38 : vector<1x1x8x8xbf16> to vector<8x8xbf16>
    %40 = vector.shape_cast %36 : vector<8x8xbf16> to vector<1x1x8x8xbf16>
    tpu.vector_store %arg9[%37, %c1_20, %c0_21, %c0_22], %40 {strides = array<i32>} : memref<1x4x8x8xbf16, #tpu.memory_space<vmem>>, vector<1x1x8x8xbf16>,
    %41 = vector.extract_strided_slice %6 {offsets = [0, 16], sizes = [8, 8], strides = [1, 1]} : vector<8x96xf32> to vector<8x8xf32>
    %42 = arith.truncf %41 : vector<8x8xf32> to vector<8x8xbf16>
    %c2 = arith.constant 2 : index
    %c0_23 = arith.constant 0 : index
    %c0_24 = arith.constant 0 : index
    %43 = vector.load %arg10[%c2, %c0_23, %c0_24] : memref<4x8x8xbf16, #tpu.memory_space<vmem>>, vector<1x8x8xbf16>
    %44 = vector.shape_cast %43 : vector<1x8x8xbf16> to vector<8x8xbf16>
    %45 = vector.shape_cast %42 : vector<8x8xbf16> to vector<1x8x8xbf16>
    tpu.vector_store %arg10[%c2, %c0_23, %c0_24], %45 {strides = array<i32>} : memref<4x8x8xbf16, #tpu.memory_space<vmem>>, vector<1x8x8xbf16>,
    %46 = vector.extract_strided_slice %6 {offsets = [0, 48], sizes = [8, 8], strides = [1, 1]} : vector<8x96xf32> to vector<8x8xf32>
    %47 = arith.truncf %46 : vector<8x8xf32> to vector<8x8xbf16>
    %48 = arith.index_cast %arg1 : i32 to index
    %c2_25 = arith.constant 2 : index
    %c0_26 = arith.constant 0 : index
    %c0_27 = arith.constant 0 : index
    %49 = vector.load %arg8[%48, %c2_25, %c0_26, %c0_27] : memref<1x4x8x8xbf16, #tpu.memory_space<vmem>>, vector<1x1x8x8xbf16>
    %50 = vector.shape_cast %49 : vector<1x1x8x8xbf16> to vector<8x8xbf16>
    %51 = vector.shape_cast %47 : vector<8x8xbf16> to vector<1x1x8x8xbf16>
    tpu.vector_store %arg8[%48, %c2_25, %c0_26, %c0_27], %51 {strides = array<i32>} : memref<1x4x8x8xbf16, #tpu.memory_space<vmem>>, vector<1x1x8x8xbf16>,
    %52 = vector.extract_strided_slice %6 {offsets = [0, 80], sizes = [8, 8], strides = [1, 1]} : vector<8x96xf32> to vector<8x8xf32>
    %53 = arith.truncf %52 : vector<8x8xf32> to vector<8x8xbf16>
    %54 = arith.index_cast %arg1 : i32 to index
    %c2_28 = arith.constant 2 : index
    %c0_29 = arith.constant 0 : index
    %c0_30 = arith.constant 0 : index
    %55 = vector.load %arg9[%54, %c2_28, %c0_29, %c0_30] : memref<1x4x8x8xbf16, #tpu.memory_space<vmem>>, vector<1x1x8x8xbf16>
    %56 = vector.shape_cast %55 : vector<1x1x8x8xbf16> to vector<8x8xbf16>
    %57 = vector.shape_cast %53 : vector<8x8xbf16> to vector<1x1x8x8xbf16>
    tpu.vector_store %arg9[%54, %c2_28, %c0_29, %c0_30], %57 {strides = array<i32>} : memref<1x4x8x8xbf16, #tpu.memory_space<vmem>>, vector<1x1x8x8xbf16>,
    %58 = vector.extract_strided_slice %6 {offsets = [0, 24], sizes = [8, 8], strides = [1, 1]} : vector<8x96xf32> to vector<8x8xf32>
    %59 = arith.truncf %58 : vector<8x8xf32> to vector<8x8xbf16>
    %c3 = arith.constant 3 : index
    %c0_31 = arith.constant 0 : index
    %c0_32 = arith.constant 0 : index
    %60 = vector.load %arg10[%c3, %c0_31, %c0_32] : memref<4x8x8xbf16, #tpu.memory_space<vmem>>, vector<1x8x8xbf16>
    %61 = vector.shape_cast %60 : vector<1x8x8xbf16> to vector<8x8xbf16>
    %62 = vector.shape_cast %59 : vector<8x8xbf16> to vector<1x8x8xbf16>
    tpu.vector_store %arg10[%c3, %c0_31, %c0_32], %62 {strides = array<i32>} : memref<4x8x8xbf16, #tpu.memory_space<vmem>>, vector<1x8x8xbf16>,
    %63 = vector.extract_strided_slice %6 {offsets = [0, 56], sizes = [8, 8], strides = [1, 1]} : vector<8x96xf32> to vector<8x8xf32>
    %64 = arith.truncf %63 : vector<8x8xf32> to vector<8x8xbf16>
    %65 = arith.index_cast %arg1 : i32 to index
    %c3_33 = arith.constant 3 : index
    %c0_34 = arith.constant 0 : index
    %c0_35 = arith.constant 0 : index
    %66 = vector.load %arg8[%65, %c3_33, %c0_34, %c0_35] : memref<1x4x8x8xbf16, #tpu.memory_space<vmem>>, vector<1x1x8x8xbf16>
    %67 = vector.shape_cast %66 : vector<1x1x8x8xbf16> to vector<8x8xbf16>
    %68 = vector.shape_cast %64 : vector<8x8xbf16> to vector<1x1x8x8xbf16>
    tpu.vector_store %arg8[%65, %c3_33, %c0_34, %c0_35], %68 {strides = array<i32>} : memref<1x4x8x8xbf16, #tpu.memory_space<vmem>>, vector<1x1x8x8xbf16>,
    %69 = vector.extract_strided_slice %6 {offsets = [0, 88], sizes = [8, 8], strides = [1, 1]} : vector<8x96xf32> to vector<8x8xf32>
    %70 = arith.truncf %69 : vector<8x8xf32> to vector<8x8xbf16>
    %71 = arith.index_cast %arg1 : i32 to index
    %c3_36 = arith.constant 3 : index
    %c0_37 = arith.constant 0 : index
    %c0_38 = arith.constant 0 : index
    %72 = vector.load %arg9[%71, %c3_36, %c0_37, %c0_38] : memref<1x4x8x8xbf16, #tpu.memory_space<vmem>>, vector<1x1x8x8xbf16>
    %73 = vector.shape_cast %72 : vector<1x1x8x8xbf16> to vector<8x8xbf16>
    %74 = vector.shape_cast %70 : vector<8x8xbf16> to vector<1x1x8x8xbf16>
    tpu.vector_store %arg9[%71, %c3_36, %c0_37, %c0_38], %74 {strides = array<i32>} : memref<1x4x8x8xbf16, #tpu.memory_space<vmem>>, vector<1x1x8x8xbf16>,
    %c0_39 = arith.constant 0 : index
    %c0_40 = arith.constant 0 : index
    %c0_41 = arith.constant 0 : index
    %75 = vector.load %arg10[%c0_39, %c0_40, %c0_41] : memref<4x8x8xbf16, #tpu.memory_space<vmem>>, vector<4x8x8xbf16>
    %76 = arith.index_cast %arg1 : i32 to index
    %c0_42 = arith.constant 0 : index
    %c0_43 = arith.constant 0 : index
    %c0_44 = arith.constant 0 : index
    %77 = vector.load %arg8[%76, %c0_42, %c0_43, %c0_44] : memref<1x4x8x8xbf16, #tpu.memory_space<vmem>>, vector<1x4x8x8xbf16>
    %78 = vector.shape_cast %77 : vector<1x4x8x8xbf16> to vector<4x8x8xbf16>
    %79 = arith.index_cast %arg1 : i32 to index
    %c0_45 = arith.constant 0 : index
    %c0_46 = arith.constant 0 : index
    %c0_47 = arith.constant 0 : index
    %80 = vector.load %arg9[%79, %c0_45, %c0_46, %c0_47] : memref<1x4x8x8xbf16, #tpu.memory_space<vmem>>, vector<1x4x8x8xbf16>
    %81 = vector.shape_cast %80 : vector<1x4x8x8xbf16> to vector<4x8x8xbf16>
    "tpu.trace_start"() <{level = 10 : i32, message = "hqd,hkd->hqk"}> : () -> ()
    %cst_48 = arith.constant dense<0.000000e+00> : vector<4x8x8xf32>
    %82 = tpu.matmul %75, %78, %cst_48 {dimension_numbers = #tpu.dot_dimension_numbers<[2], [2], [1], [1], [0, 0, 0, 1, 1, 1], [0], [0]>} : vector<4x8x8xbf16>, vector<4x8x8xbf16>, vector<4x8x8xf32> -> vector<4x8x8xf32>
    "tpu.trace_stop"() : () -> ()
    %83 = tpu.iota {dimensions = array<i32: 0>} : vector<8x8xi32>
    %84 = tpu.iota {dimensions = array<i32: 1>} : vector<8x8xi32>
    %85 = arith.cmpi sgt, %84, %83 : vector<8x8xi32>
    %86 = vector.shape_cast %85 : vector<8x8xi1> to vector<1x8x8xi1>
    %cst_49 = arith.constant -1.000000e+30 : f32
    %87 = vector.shape_cast %86 : vector<1x8x8xi1> to vector<1x8x8xi1>
    %88 = vector.broadcast %87 : vector<1x8x8xi1> to vector<4x8x8xi1>
    %89 = vector.broadcast %cst_49 : f32 to vector<4x8x8xf32>
    %90 = arith.select %88, %89, %82 : vector<4x8x8xi1>, vector<4x8x8xf32>
    %cst_50 = arith.constant dense<0xFF800000> : vector<4x8xf32>
    %91 = vector.multi_reduction <maximumf>, %90, %cst_50 [2] : vector<4x8x8xf32> to vector<4x8xf32>
    %92 = vector.shape_cast %91 : vector<4x8xf32> to vector<4x8x1xf32>
    %93 = vector.broadcast %92 : vector<4x8x1xf32> to vector<4x8x8xf32>
    %94 = arith.subf %90, %93 : vector<4x8x8xf32>
    %95 = math.exp %94 : vector<4x8x8xf32>
    %cst_51 = arith.constant dense<0.000000e+00> : vector<4x8xf32>
    %96 = vector.multi_reduction <add>, %95, %cst_51 [2] : vector<4x8x8xf32> to vector<4x8xf32>
    %97 = vector.shape_cast %96 : vector<4x8xf32> to vector<4x8x1xf32>
    %98 = arith.truncf %95 : vector<4x8x8xf32> to vector<4x8x8xbf16>
    "tpu.trace_start"() <{level = 10 : i32, message = "hqk,hkd->hqd"}> : () -> ()
    %cst_52 = arith.constant dense<0.000000e+00> : vector<4x8x8xf32>
    %99 = tpu.matmul %98, %81, %cst_52 {dimension_numbers = #tpu.dot_dimension_numbers<[2], [1], [1], [2], [0, 0, 0, 1, 1, 2], [0], [0]>} : vector<4x8x8xbf16>, vector<4x8x8xbf16>, vector<4x8x8xf32> -> vector<4x8x8xf32>
    %c0_i32 = arith.constant 0 : i32
    "tpu.trace_stop"() : () -> ()
    %100 = arith.subi %arg1, %c0_i32 : i32
    %101 = arith.addi %c0_i32, %100 : i32
    %c1_i32 = arith.constant 1 : i32
    %102:3 = scf.for %arg12 = %c0_i32 to %101 step %c1_i32 iter_args(%arg13 = %92, %arg14 = %97, %arg15 = %99) -> (vector<4x8x1xf32>, vector<4x8x1xf32>, vector<4x8x8xf32>)  : i32 {
      %131 = arith.index_cast %arg12 : i32 to index
      %c0_68 = arith.constant 0 : index
      %c0_69 = arith.constant 0 : index
      %c0_70 = arith.constant 0 : index
      %132 = vector.load %arg8[%131, %c0_68, %c0_69, %c0_70] : memref<1x4x8x8xbf16, #tpu.memory_space<vmem>>, vector<1x4x8x8xbf16>
      %133 = vector.shape_cast %132 : vector<1x4x8x8xbf16> to vector<4x8x8xbf16>
      %134 = arith.index_cast %arg12 : i32 to index
      %c0_71 = arith.constant 0 : index
      %c0_72 = arith.constant 0 : index
      %c0_73 = arith.constant 0 : index
      %135 = vector.load %arg9[%134, %c0_71, %c0_72, %c0_73] : memref<1x4x8x8xbf16, #tpu.memory_space<vmem>>, vector<1x4x8x8xbf16>
      %136 = vector.shape_cast %135 : vector<1x4x8x8xbf16> to vector<4x8x8xbf16>
      "tpu.trace_start"() <{level = 10 : i32, message = "hqd,hkd->hqk"}> : () -> ()
      %cst_74 = arith.constant dense<0.000000e+00> : vector<4x8x8xf32>
      %137 = tpu.matmul %75, %133, %cst_74 {dimension_numbers = #tpu.dot_dimension_numbers<[2], [2], [1], [1], [0, 0, 0, 1, 1, 1], [0], [0]>} : vector<4x8x8xbf16>, vector<4x8x8xbf16>, vector<4x8x8xf32> -> vector<4x8x8xf32>
      "tpu.trace_stop"() : () -> ()
      %cst_75 = arith.constant dense<0xFF800000> : vector<4x8xf32>
      %138 = vector.multi_reduction <maximumf>, %137, %cst_75 [2] : vector<4x8x8xf32> to vector<4x8xf32>
      %139 = vector.shape_cast %138 : vector<4x8xf32> to vector<4x8x1xf32>
      %140 = arith.maximumf %arg13, %139 : vector<4x8x1xf32>
      %141 = arith.subf %arg13, %140 : vector<4x8x1xf32>
      %142 = math.exp %141 : vector<4x8x1xf32>
      %143 = vector.broadcast %140 : vector<4x8x1xf32> to vector<4x8x8xf32>
      %144 = arith.subf %137, %143 : vector<4x8x8xf32>
      %145 = math.exp %144 : vector<4x8x8xf32>
      %146 = arith.mulf %142, %arg14 : vector<4x8x1xf32>
      %cst_76 = arith.constant dense<0.000000e+00> : vector<4x8xf32>
      %147 = vector.multi_reduction <add>, %145, %cst_76 [2] : vector<4x8x8xf32> to vector<4x8xf32>
      %148 = vector.shape_cast %147 : vector<4x8xf32> to vector<4x8x1xf32>
      %149 = arith.addf %146, %148 : vector<4x8x1xf32>
      %150 = vector.broadcast %142 : vector<4x8x1xf32> to vector<4x8x8xf32>
      %151 = arith.mulf %150, %arg15 : vector<4x8x8xf32>
      %152 = arith.truncf %145 : vector<4x8x8xf32> to vector<4x8x8xbf16>
      "tpu.trace_start"() <{level = 10 : i32, message = "hqk,hkd->hqd"}> : () -> ()
      %cst_77 = arith.constant dense<0.000000e+00> : vector<4x8x8xf32>
      %153 = tpu.matmul %152, %136, %cst_77 {dimension_numbers = #tpu.dot_dimension_numbers<[2], [1], [1], [2], [0, 0, 0, 1, 1, 2], [0], [0]>} : vector<4x8x8xbf16>, vector<4x8x8xbf16>, vector<4x8x8xf32> -> vector<4x8x8xf32>
      "tpu.trace_stop"() : () -> ()
      %154 = arith.addf %151, %153 : vector<4x8x8xf32>
      scf.yield %140, %149, %154 : vector<4x8x1xf32>, vector<4x8x1xf32>, vector<4x8x8xf32>
    }
    %103 = tpu.reciprocal %102#1 {approx = true} : vector<4x8x1xf32> -> vector<4x8x1xf32>
    %104 = vector.broadcast %103 : vector<4x8x1xf32> to vector<4x8x8xf32>
    %105 = arith.mulf %102#2, %104 : vector<4x8x8xf32>
    %106 = vector.extract_strided_slice %105 {offsets = [0, 0, 0], sizes = [1, 8, 8], strides = [1, 1, 1]} : vector<4x8x8xf32> to vector<1x8x8xf32>
    %107 = vector.shape_cast %106 : vector<1x8x8xf32> to vector<8x8xf32>
    %108 = arith.truncf %107 : vector<8x8xf32> to vector<8x8xbf16>
    %c0_53 = arith.constant 0 : index
    %c0_54 = arith.constant 0 : index
    %109 = vector.load %arg11[%c0_53, %c0_54] : memref<8x32xbf16, #tpu.memory_space<vmem>>, vector<8x8xbf16>
    tpu.vector_store %arg11[%c0_53, %c0_54], %108 {strides = array<i32>} : memref<8x32xbf16, #tpu.memory_space<vmem>>, vector<8x8xbf16>,
    %110 = vector.extract_strided_slice %105 {offsets = [1, 0, 0], sizes = [1, 8, 8], strides = [1, 1, 1]} : vector<4x8x8xf32> to vector<1x8x8xf32>
    %111 = vector.shape_cast %110 : vector<1x8x8xf32> to vector<8x8xf32>
    %112 = arith.truncf %111 : vector<8x8xf32> to vector<8x8xbf16>
    %c0_55 = arith.constant 0 : index
    %c8 = arith.constant 8 : index
    %113 = vector.load %arg11[%c0_55, %c8] : memref<8x32xbf16, #tpu.memory_space<vmem>>, vector<8x8xbf16>
    tpu.vector_store %arg11[%c0_55, %c8], %112 {strides = array<i32>} : memref<8x32xbf16, #tpu.memory_space<vmem>>, vector<8x8xbf16>,
    %114 = vector.extract_strided_slice %105 {offsets = [2, 0, 0], sizes = [1, 8, 8], strides = [1, 1, 1]} : vector<4x8x8xf32> to vector<1x8x8xf32>
    %115 = vector.shape_cast %114 : vector<1x8x8xf32> to vector<8x8xf32>
    %116 = arith.truncf %115 : vector<8x8xf32> to vector<8x8xbf16>
    %c0_56 = arith.constant 0 : index
    %c16 = arith.constant 16 : index
    %117 = vector.load %arg11[%c0_56, %c16] : memref<8x32xbf16, #tpu.memory_space<vmem>>, vector<8x8xbf16>
    tpu.vector_store %arg11[%c0_56, %c16], %116 {strides = array<i32>} : memref<8x32xbf16, #tpu.memory_space<vmem>>, vector<8x8xbf16>,
    %118 = vector.extract_strided_slice %105 {offsets = [3, 0, 0], sizes = [1, 8, 8], strides = [1, 1, 1]} : vector<4x8x8xf32> to vector<1x8x8xf32>
    %119 = vector.shape_cast %118 : vector<1x8x8xf32> to vector<8x8xf32>
    %120 = arith.truncf %119 : vector<8x8xf32> to vector<8x8xbf16>
    %c0_57 = arith.constant 0 : index
    %c24 = arith.constant 24 : index
    %121 = vector.load %arg11[%c0_57, %c24] : memref<8x32xbf16, #tpu.memory_space<vmem>>, vector<8x8xbf16>
    tpu.vector_store %arg11[%c0_57, %c24], %120 {strides = array<i32>} : memref<8x32xbf16, #tpu.memory_space<vmem>>, vector<8x8xbf16>,
    %c0_58 = arith.constant 0 : index
    %c0_59 = arith.constant 0 : index
    %122 = vector.load %arg11[%c0_58, %c0_59] : memref<8x32xbf16, #tpu.memory_space<vmem>>, vector<8x32xbf16>
    %c0_60 = arith.constant 0 : index
    %c0_61 = arith.constant 0 : index
    %123 = vector.load %arg5[%c0_60, %c0_61] : memref<32x32xbf16, #tpu.memory_space<vmem>>, vector<32x32xbf16>
    %cst_62 = arith.constant dense<0.000000e+00> : vector<8x32xf32>
    %124 = tpu.matmul %122, %123, %cst_62 {dimension_numbers = #tpu.dot_dimension_numbers<[1], [0], [0], [1], [0, 0, 1, 1], [], []>} : vector<8x32xbf16>, vector<32x32xbf16>, vector<8x32xf32> -> vector<8x32xf32>
    %c0_63 = arith.constant 0 : index
    %c0_64 = arith.constant 0 : index
    %125 = vector.load %arg6[%c0_63, %c0_64] : memref<1x32xf32, #tpu.memory_space<vmem>>, vector<1x32xf32>
    %126 = vector.broadcast %125 : vector<1x32xf32> to vector<8x32xf32>
    %127 = arith.addf %124, %126 : vector<8x32xf32>
    %c0_65 = arith.constant 0 : index
    %c0_66 = arith.constant 0 : index
    %c0_67 = arith.constant 0 : index
    %128 = vector.load %arg7[%c0_65, %c0_66, %c0_67] : memref<1x8x32xf32, #tpu.memory_space<vmem>>, vector<1x8x32xf32>
    %129 = vector.shape_cast %128 : vector<1x8x32xf32> to vector<8x32xf32>
    %130 = vector.shape_cast %127 : vector<8x32xf32> to vector<1x8x32xf32>
    tpu.vector_store %arg7[%c0_65, %c0_66, %c0_67], %130 {strides = array<i32>} : memref<1x8x32xf32, #tpu.memory_space<vmem>>, vector<1x8x32xf32>,
    return
  }
  func.func @transform_0(%arg0: i32, %arg1: i32) -> (i32, i32, i32) {
    %c0_i32 = arith.constant 0 : i32
    %c0_i32_0 = arith.constant 0 : i32
    return %arg0, %arg1, %c0_i32 : i32, i32, i32
  }
  func.func @transform_1(%arg0: i32, %arg1: i32) -> (i32, i32) {
    %c0_i32 = arith.constant 0 : i32
    %c0_i32_0 = arith.constant 0 : i32
    %c0_i32_1 = arith.constant 0 : i32
    return %c0_i32, %c0_i32_0 : i32, i32
  }
  func.func @transform_2(%arg0: i32, %arg1: i32) -> (i32, i32) {
    %c0_i32 = arith.constant 0 : i32
    %c0_i32_0 = arith.constant 0 : i32
    %c0_i32_1 = arith.constant 0 : i32
    return %c0_i32, %c0_i32_0 : i32, i32
  }
  func.func @transform_3(%arg0: i32, %arg1: i32) -> (i32, i32) {
    %c0_i32 = arith.constant 0 : i32
    %c0_i32_0 = arith.constant 0 : i32
    %c0_i32_1 = arith.constant 0 : i32
    return %c0_i32, %c0_i32_0 : i32, i32
  }
  func.func @transform_4(%arg0: i32, %arg1: i32) -> (i32, i32) {
    %c0_i32 = arith.constant 0 : i32
    %c0_i32_0 = arith.constant 0 : i32
    %c0_i32_1 = arith.constant 0 : i32
    return %c0_i32, %c0_i32_0 : i32, i32
  }
  func.func @transform_5(%arg0: i32, %arg1: i32) -> (i32, i32, i32) {
    %c0_i32 = arith.constant 0 : i32
    %c0_i32_0 = arith.constant 0 : i32
    return %arg0, %arg1, %c0_i32 : i32, i32, i32
  }
}

</mosaic_0001>

<bundles_post_ra>
// kernel: tpu_custom_call.1
= control target key start
LH: loop header
LB: loop body
LE: loop exit
PB: predicated region body
PF: predicated region fallthrough
CT: control target
= control target key end

     0   :  { %s2380_s0 = inlined_call_operand.hbm [shape: bf16[2,8,32], index: 0, kind: input, shape index: {}]   ;;  %s2381_s1 = inlined_call_operand.hbm [shape: bf16[32,96], index: 1, kind: input, shape index: {}]   ;;  %s2382_s2 = inlined_call_operand.vmem [shape: f32[1,96], index: 2, kind: input, shape index: {}]   ;;  %s2383_s3 = inlined_call_operand.hbm [shape: bf16[32,32], index: 3, kind: input, shape index: {}]   ;;  %s2384_s4 = inlined_call_operand.vmem [shape: f32[1,32], index: 4, kind: input, shape index: {}]   ;;  %s2385_s5 = inlined_call_operand.hbm [shape: f32[2,8,32], index: 5, kind: output, shape index: {}]  }
   0x1   :  { %2389 = sst [smem:[#allocation16_spill]] %s2381_s1 }
   0x2   :  { %10 = vsyncpa [#allocation7], 0 }
   0x3   :  { %12 = vsyncpa [#allocation7 + $0x1], 0 }
   0x4   :  { %13 = vsyncpa [#allocation10], 0 }
   0x5   :  { %14 = vsyncpa [#allocation8], 0 }
   0x6   :  { %16 = vsyncpa [#allocation8 + $0x1], 0  ;;  %s2097_s18 = smov 0   ;;  %s2099_s19 = smov 0  }
   0x7   :  { %s2101_s20 = smov 0   ;;  %s2103_s21 = smov 0  }
   0x8   :  { %s2105_s22 = smov 0   ;;  %s2107_s23 = smov 0  }
   0x9 LB: > { %s1612_s24 = sadd.s32 4294967295, %s2043_s23   ;;  %s1613_s25 = sadd.s32 4294967294, %s2043_s23   ;;  %s2043_s23 = sphi %s2107_s23, %s22_s23   ;;  %s2039_s22 = sphi %s2105_s22, %s2407_s22   ;;  %s2035_s21 = sphi %s2103_s21, %s2406_s21   ;;  %s2031_s20 = sphi %s2101_s20, %s2405_s20   ;;  %s2027_s19 = sphi %s2099_s19, %s2404_s19   ;;  %s2023_s18 = sphi %s2097_s18, %s2403_s18  }
   0xa   : > { %p56_p0 = scmp.ne.s32.totalorder %s2027_s19, %s2023_s18  ;;  %p2131_p1 = scmp.eq.s32.totalorder %s1612_s24, 0 }
   0xb   : > { %p2135_p2 = scmp.eq.s32.totalorder %s1612_s24, 1  ;;  %p172_p3 = scmp.eq.s32.totalorder %s1613_s25, 1 }
   0xc   : > { %s2390_s26 = scalar_select %p2131_p1, 1, 0 }
   0xd   : > { %p2141_p4 = por %p2131_p1, %p56_p0  ;;  %p1614_p5 = scmp.ge.s32.totalorder %s2043_s23, 1 }
   0xe   : > { %p2146_p6 = por %p172_p3, %p56_p0  ;;  %p179_p7 = scmp.lt.s32.totalorder %s2043_s23, 3 }
   0xf   : > { %s2392_s28 = scalar_select %p2141_p4, 1, 0 }
  0x10   : > { %s2393_s29 = scalar_select %p2146_p6, 1, 0 }
  0x11   : > { %p2151_p8 = pnand %p1614_p5, %p179_p7  ;;  %s2045_s6 = smov [#allocation9]  }
  0x12   : > { %s191_s7 = sshll.u32 %s2045_s6, 4  ;;  %s2046_s9 = smov [#allocation11]   ;;  %s192_s7 = int_to_ptr.vmem [resolvable:$true] %s191_s7 }
  0x13   : > { %p1770_p9 = pneg %p2151_p8  ;;  %s207_s10 = sshll.u32 %s2046_s9, 4  ;;  %s208_s10 = int_to_ptr.vmem [resolvable:$true] %s207_s10 }
  0x14   : > { %s1890_s11 = scalar_lea.vmem %s192_s7, 256  ;;  %p1898_p5 = scmp.lt.s32.totalorder %s192_s7, %s192_s7 }
  0x15   : > { %p2160_p11 = pnand %p1770_p9, %p2131_p1  ;;  %p1891_p13 = scmp.ne.s32.totalorder %s192_s7, %s1890_s11 }
  0x16   : > { %p1899_p7 = scmp.lt.s32.totalorder %s1890_s11, %s1890_s11 }
  0x17   : > { %p1881_p12 = pneg %p2160_p11 }
  0x18   : > { %p1900_p10 = por %p1899_p7, %p1898_p5 }
  0x19   : > { %p1893_p0 = pnand %p1891_p13, %p1881_p12 }
  0x1b   : > { %p1894_p3 = pneg %p1893_p0 }
  0x1d   : > { %p1901_p9 = pnand %p1900_p10, %p1894_p3 }
  0x1f   : > { %1904 = shalt.err (!%p1901_p9)
}
  0x20   : > { %s2047_s12 = smov 64   ;;  %s2048_s13 = smov 4  }
  0x21   : > { %s2396_s1 = sld [smem:[#allocation16_spill]]  ;;  %s1916_s16 = scalar_lea.vmem %s208_s10, 256 }
  0x22   : > { %p1917_p6 = scmp.ne.s32.totalorder %s208_s10, %s1916_s16  ;;  %p1924_p1 = scmp.lt.s32.totalorder %s208_s10, %s208_s10 }
  0x23   : > { %p1925_p4 = scmp.lt.s32.totalorder %s1916_s16, %s1916_s16 }
  0x24   : > { %p1919_p13 = pnand %p1917_p6, %p1881_p12 }
  0x25   : > { %p1926_p5 = por %p1925_p4, %p1924_p1 }
  0x26   : > { %p1920_p0 = pneg %p1919_p13 }
  0x27   : > { %1773 = dma.hbm_to_vmem [thread:$0]  (!%p2160_p11), %s2396_s1, 256, %s192_s7, [#allocation10], %s2047_s12, %s2047_s12, %s2048_s13  }
  0x28   : > { %p1927_p10 = pnand %p1926_p5, %p1920_p0 }
  0x2a   : > { %1930 = shalt.err (!%p1927_p10)
}
  0x2b   : > { %1776 = dma.hbm_to_vmem [thread:$0]  (!%p2160_p11), %s2383_s3, 256, %s208_s10, [#allocation10], %s2047_s12, %s2047_s12, %s2048_s13  }
  0x2c   : > { %s34_s25 = sadd.s32 1, %s2039_s22  ;;  %s43_s6 = sadd.s32 1, %s2031_s20 }
  0x2d   : > { %p36_p1 = scmp.ge.s32.totalorder %s34_s25, 2  ;;  %p50_p4 = scmp.ne.s32.totalorder %s2031_s20, %s2027_s19 }
  0x2e   : > { %p51_p6 = scmp.eq.s32.totalorder %s2043_s23, 0  ;;  %p1787_p12 = scmp.lt.s32.totalorder %s2043_s23, 2 }
  0x2f   : > { %s2409_s25 = smov (%p36_p1, %s34_s25), 0  ;;  %p2192_p7 = por %p2135_p2, %p50_p4 }
  0x30   : > { %p52_p3 = por %p51_p6, %p50_p4  ;;  %s38_s8 = ssub.s32 %s2039_s22, %s2409_s25 }
  0x31   : > { %s224_s9 = sand.u32 1, %s2031_s20   ;;  %p41_p9 = scmp.eq.s32.totalorder %s38_s8, 0 }
  0x32   : > { %s1618_s10 = sshll.u32 %s224_s9, 2  ;;  %s1619_s11 = sshll.u32 %s2039_s22, 6 }
  0x33   : > { %s2201_s12 = scalar_select %p41_p9, %s2031_s20, %s43_s6  }
  0x34   : > { %s234_s15 = scalar_lea.hbm %s2380_s0, %s1619_s11  ;;  %s228_s16 = scalar_lea.vmem [#allocation6], %s1618_s10 }
  0x35   : > { %s236_s17 = sshll.u32 %s228_s16, 4  ;;  %p2208_p11 = pnand %p1787_p12, %p52_p3  ;;  %s237_s17 = int_to_ptr.vmem [resolvable:$true] %s236_s17 }
  0x36   : > { %s225_s24 = scalar_lea.sflag [#allocation7], %s224_s9  ;;  %s1944_s8 = scalar_lea.vmem %s237_s17, 64 }
  0x37   : > { %p1933_p2 = pneg %p2208_p11  ;;  %p1945_p13 = scmp.ne.s32.totalorder %s237_s17, %s1944_s8 }
  0x38   : > { %s2049_s6 = smov [#allocation6]  }
  0x39   : > { %p1947_p0 = pnand %p1945_p13, %p1933_p2  ;;  %s1949_s1 = sshll.u32 %s2049_s6, 4  ;;  %s1950_s1 = int_to_ptr.vmem [resolvable:$false] %s1949_s1 }
  0x3a   : > { %s1951_s11 = scalar_lea.vmem %s1950_s1, 128  ;;  %p1952_p10 = scmp.lt.s32.totalorder %s237_s17, %s1950_s1 }
  0x3b   : > { %p1948_p5 = pneg %p1947_p0  ;;  %p1953_p1 = scmp.lt.s32.totalorder %s1951_s11, %s1944_s8 }
  0x3d   : > { %p1954_p4 = por %p1953_p1, %p1952_p10 }
  0x3f   : > { %p1955_p6 = pnand %p1954_p4, %p1948_p5 }
  0x41   : > { %1958 = shalt.err (!%p1955_p6)
}
  0x42   : > { %1780 = dma.hbm_to_vmem [thread:$0]  (!%p2208_p11), %s234_s15, 64, %s237_s17, %s225_s24  }
  0x43   : > { %245 = sbr.rel (%p2151_p8) target bundleno = 1308 (0x51c), region = 40  ;;  %s2219_s9 = sand.u32 (!%p2151_p8), 1, %s2027_s19  }
  0x44   : > { %s1621_s10 = sshll.u32 (!%p2151_p8), %s2219_s9, 2  ;;  %s248_s13 = scalar_lea.sflag (!%p2151_p8), [#allocation7], %s2219_s9 }
  0x45   : > { %s251_s14 = scalar_lea.vmem (!%p2151_p8), [#allocation6], %s1621_s10  ;;  %p2399_p12 = scmp.ne.s32.totalorder (!%p2151_p8), %s2392_s28, 0 }
  0x48   : > { %2010 = dma.done.wait (%p2399_p12), %s248_s13, 64  }
  0x49   : > { %2012 = vsyncadd (%p2399_p12), %s248_s13, 4294967232  ;;  %p2400_p3 = scmp.ne.s32.totalorder %s2390_s26, 0 }
  0x4b   : > { %2014 = dma.done.wait (%p2400_p3), [#allocation10], 512  }
  0x4c   : > { %2016 = vsyncadd (%p2400_p3), [#allocation10], 4294966784  ;;  %v2050_v0 = vmov 0.0   ;;  %vm2051_vm0 = vmmov 0   ;;  %v1859_v1 = vld [vmem:[#allocation9 + $0x8] sm:$0xff]   ;;  %v1860_v2 = vld [vmem:[#allocation9] sm:$0xff]   ;;  %v625_v36 = vlaneseq }
  0x4d   : > { %1694 = vmatprep.subr.bf16.mxu0 %v2050_v0  ;;  %1698 = vmatprep.mubr.msk.bf16.mxu0 %vm2051_vm0, %v2050_v0  ;;  %v287_v3 = vld [vmem:[%s251_s14] sm:$0xf]  ;;  %vm311_vm1 = vcmask 261120   ;;  %v1625_v4 = vld [vmem:[%s2382_s2] ss:$0 sm:$0xff]  ;;  %vm356_vm2 = vcmask 60416  }
  0x4e   : > { %1702 = vmatprep.subr.bf16.mxu1 %v2050_v0  ;;  %1704 = vmatprep.mubr.msk.bf16.mxu1 %vm2051_vm0, %v2050_v0  ;;  %s2052_s28 = smov 80   ;;  %s2053_s30 = smov 96   ;;  %vm440_vm3 = vcmask 64512   ;;  %vm679_vm4 = vcmask 1043456   ;;  %v626_v37 = vshrl.u32 %v625_v36, 7  ;;  %v628_v38 = vand.u32 127, %v625_v36 }
  0x4f   : > { %1695 = vmatpush3.bf16.msra.mxu0 %v1859_v1  ;;  %s2054_s15 = smov 120   ;;  %s2055_s16 = smov 88   ;;  %vm1337_vm6 = vcmask 126016   ;;  %vm1346_vm7 = vcmask 191616   ;;  %vm1355_vm8 = vcmask 257216  }
  0x50   : > { %1696 = vmatprep.subr.bf16.mxu0 %v2050_v0  ;;  %s2056_s17 = smov 112   ;;  %s2057_s27 = smov 72   ;;  %vm629_vm5 = vcmp.gt.s32.totalorder %v628_v38, %v626_v37 }
  0x51   : > { %s2058_s24 = smov 56   ;;  %s2059_s8 = smov 104  }
  0x52   : > { %s2060_s6 = smov 64   ;;  %s2061_s11 = smov 48  }
  0x53   : > { %1697 = vmatpush3.bf16.msra.mxu0 %v1860_v2  ;;  %s2062_s10 = smov 40   ;;  %s2063_s13 = smov 8  }
  0x54   : > { %1708 = vmatprep.subr.bf16.mxu0 %v2050_v0  ;;  %s2064_s14 = smov 16   ;;  %s2065_s1 = smov 24  }
  0x55   : > { %s1624_s26 = sshll.u32 %s2219_s9, 3 }
  0x56   : > { %1699 = vmatmul.mubr.msk.bf16.vlgmr.msra.gmra.mxu0 %vm311_vm1, %v287_v3 }
  0x57   : > { %1710 = vmatprep.mubr.msk.bf16.mxu0 %vm2051_vm0, %v2050_v0 }
 0x116   : > { %v349_v5 = vpop.f32.mrf.mxu0 }
 0x117   : > { %v350_v6 = vadd.f32 %v1625_v4, %v349_v5 }
 0x118   : > { %v1700_v7 = vpop.f32.mrf.mxu0 }
 0x119   : > { %v2245_v8 = vpack.c.bf16 %v350_v6, %v350_v6 }
 0x11a   : > { %v352_v9 = vpop.f32.mrf.mxu0 }
 0x11b   : > { %397 = vrot.lane.b32.xlu1 %v2245_v8, %s2052_s28  ;;  %361 = vrot.lane.b32.xlu0 %v2245_v8, %s2053_s30  ;;  %357 = vst.msk [vmem:[#allocation4] sm:$0xf] %vm356_vm2, %v2245_v8 }
 0x11c   : > { %v1701_v10 = vpop.f32.mrf.mxu0 }
 0x11f   : > { %374 = vrot.lane.b32.xlu1 %v2245_v8, %s2054_s15  ;;  %379 = vrot.lane.b32.xlu0 %v2245_v8, %s2055_s16  ;;  %s1663_s15 = sshll.u32 %s2035_s21, 7  ;;  %s285_s16 = scalar_lea.vmem [#allocation12], %s1624_s26 }
 0x122   : > { %v428_v25 = vld [vmem:[#allocation4] sm:$0xf] }
 0x123   : > { %392 = vrot.lane.b32.xlu1 %v2245_v8, %s2056_s17  ;;  %415 = vrot.lane.b32.xlu0 %v2245_v8, %s2057_s27  ;;  %s1440_s17 = sshll.u32 %s285_s16, 4  ;;  %s2333_s17 = int_to_ptr.vmem [resolvable:$true] %s1440_s17 }
 0x124   : > { %s1959_s21 = scalar_lea.vmem %s2333_s17, 128 }
 0x125   : > { %p1960_p8 = scmp.ne.s32.totalorder %s2333_s17, %s1959_s21 }
 0x127   : > { %386 = vrot.lane.b32.xlu1 %v2245_v8, %s2058_s24  ;;  %410 = vrot.lane.b32.xlu0 %v2245_v8, %s2059_s8  ;;  %s2331_s8 = scalar_lea.hbm %s2385_s5, %s1663_s15  ;;  %p1961_p9 = pnand %p1960_p8, %p2192_p7 }
 0x129   : > { %p1962_p11 = pneg %p1961_p9 }
 0x12b   : > { %368 = vrot.lane.b32.xlu0 %v2245_v8, %s2060_s6  ;;  %s1426_s6 = scalar_lea.sflag [#allocation8], %s2219_s9 }
 0x18d   : > { %v398_v11 = vpop.permute.xlu1 %397  ;;  %v362_v12 = vpop.permute.xlu0 %361 }
 0x18e   : > { %1632 = vst.msk [vmem:[#allocation2 + $0x8] sm:$0xf] %vm356_vm2, %v398_v11  ;;  %367 = vst.msk [vmem:[#allocation2] sm:$0xf] %vm356_vm2, %v362_v12 }
 0x191   : > { %v375_v13 = vpop.permute.xlu1 %374  ;;  %v380_v14 = vpop.permute.xlu0 %379 }
 0x192   : > { %378 = vst.msk [vmem:[#allocation4 + $0x4] sm:$0xf] %vm356_vm2, %v375_v13  ;;  %1630 = vst.msk [vmem:[#allocation2 + $0x4] sm:$0xf] %vm356_vm2, %v380_v14 }
 0x195   : > { %v393_v15 = vpop.permute.xlu1 %392  ;;  %v416_v16 = vpop.permute.xlu0 %415  ;;  %v432_v17 = vld [vmem:[#allocation2] sm:$0xf]  ;;  %v434_v23 = vld [vmem:[#allocation2 + $0x8] sm:$0xf] }
 0x196   : > { %396 = vst.msk [vmem:[#allocation4 + $0x8] sm:$0xf] %vm356_vm2, %v393_v15  ;;  %1634 = vst.msk [vmem:[#allocation2 + $0xc] sm:$0xf] %vm356_vm2, %v416_v16  ;;  %v445_v18 = vsel %vm440_vm3, %v432_v17, 0  ;;  %v537_v26 = vsel %vm440_vm3, %v434_v23, 0 }
 0x197   : > { %1703 = vmatpush3.bf16.xpose.msra.mxu1 %v445_v18 }
 0x198   : > { %1714 = vmatprep.subr.bf16.mxu1 %v2050_v0 }
 0x199   : > { %v387_v19 = vpop.permute.xlu1 %386  ;;  %v411_v20 = vpop.permute.xlu0 %410  ;;  %v433_v21 = vld [vmem:[#allocation2 + $0x4] sm:$0xf] }
 0x19a   : > { %1631 = vst.msk [vmem:[#allocation3 + $0x4] sm:$0xf] %vm356_vm2, %v387_v19  ;;  %414 = vst.msk [vmem:[#allocation4 + $0xc] sm:$0xf] %vm356_vm2, %v411_v20  ;;  %v491_v22 = vsel %vm440_vm3, %v433_v21, 0 }
 0x19b   : > { %1709 = vmatpush3.bf16.xpose.msra.mxu0 %v491_v22  ;;  %v429_v28 = vld [vmem:[#allocation4 + $0x4] sm:$0xf] }
 0x19c   : > { %1720 = vmatprep.subr.bf16.mxu0 %v2050_v0 }
 0x19d   : > { %v369_v24 = vpop.permute.xlu0 %368  ;;  %v435_v27 = vld [vmem:[#allocation2 + $0xc] sm:$0xf]  ;;  %v430_v30 = vld [vmem:[#allocation4 + $0x8] sm:$0xf] }
 0x19e   : > { %373 = vst.msk [vmem:[#allocation3] sm:$0xf] %vm356_vm2, %v369_v24  ;;  %1705 = vmatmul.mubr.msk.bf16.vlgmr.msra.gmra.mxu1 %vm440_vm3, %v428_v25  ;;  %v583_v29 = vsel %vm440_vm3, %v435_v27, 0 }
 0x19f   : > { %1715 = vmatpush3.bf16.xpose.msra.mxu1 %v537_v26  ;;  %1716 = vmatprep.mubr.msk.bf16.mxu1 %vm2051_vm0, %v2050_v0 }
 0x1a0   : > { %1726 = vmatprep.subr.bf16.mxu1 %v2050_v0 }
 0x1a1   : > { %v437_v33 = vld [vmem:[#allocation3 + $0x4] sm:$0xf]  ;;  %v431_v34 = vld [vmem:[#allocation4 + $0xc] sm:$0xf] }
 0x1a2   : > { %1711 = vmatmul.mubr.msk.bf16.vlgmr.msra.gmra.mxu0 %vm440_vm3, %v429_v28  ;;  %v727_v35 = vsel %vm679_vm4, %v437_v33, 0 }
 0x1a3   : > { %1721 = vmatpush3.bf16.xpose.msra.mxu0 %v583_v29  ;;  %1722 = vmatprep.mubr.msk.bf16.mxu0 %vm2051_vm0, %v2050_v0 }
 0x1a4   : > { %1732 = vmatprep.subr.bf16.mxu0 %v2050_v0 }
 0x1a5   : > { %v436_v31 = vld [vmem:[#allocation3] sm:$0xf] }
 0x1a6   : > { %1717 = vmatmul.mubr.msk.bf16.vlgmr.msra.gmra.mxu1 %vm440_vm3, %v430_v30  ;;  %v681_v32 = vsel %vm679_vm4, %v436_v31, 0 }
 0x1a7   : > { %1727 = vmatpush3.bf16.msra.mxu1 %v681_v32  ;;  %1728 = vmatprep.mubr.msk.bf16.mxu1 %vm2051_vm0, %v2050_v0 }
 0x1a8   : > { %1738 = vmatprep.subr.bf16.mxu1 %v2050_v0 }
 0x1aa   : > { %1723 = vmatmul.mubr.msk.bf16.vlgmr.msra.gmra.mxu0 %vm440_vm3, %v431_v34 }
 0x1ab   : > { %1733 = vmatpush3.bf16.msra.mxu0 %v727_v35  ;;  %1734 = vmatprep.mubr.msk.bf16.mxu0 %vm2051_vm0, %v2050_v0 }
 0x1ac   : > { %1744 = vmatprep.subr.bf16.mxu0 %v2050_v0 }
 0x25e   : > { %v481_v39 = vpop.f32.mrf.mxu1 }
 0x25f   : > { %v632_v40 = vsel %vm629_vm5, -1e+30, %v481_v39 }
 0x260   : > { %v1706_v41 = vpop.f32.mrf.mxu1  ;;  %v636_v42 = vsel %vm440_vm3, %v632_v40, -inf }
 0x261   : > { %637 = vmax.xlane.f32.xlu1 %v636_v42  ;;  %v1861_v42 = vld [vmem:[#allocation11 + $0x8] sm:$0xff]  }
 0x262   : > { %v484_v43 = vpop.f32.mrf.mxu1  ;;  %v527_v44 = vpop.f32.mrf.mxu0 }
 0x263   : > { %v633_v45 = vsel %vm629_vm5, -1e+30, %v527_v44 }
 0x264   : > { %v1707_v46 = vpop.f32.mrf.mxu1  ;;  %v1712_v47 = vpop.f32.mrf.mxu0  ;;  %v639_v48 = vsel %vm440_vm3, %v633_v45, -inf }
 0x265   : > { %640 = vmax.xlane.f32.xlu0 %v639_v48  ;;  %v1862_v46 = vld [vmem:[#allocation11] sm:$0xff]  }
 0x266   : > { %v530_v49 = vpop.f32.mrf.mxu0  ;;  %v573_v50 = vpop.f32.mrf.mxu1 }
 0x267   : > { %v634_v51 = vsel %vm629_vm5, -1e+30, %v573_v50 }
 0x268   : > { %v1713_v52 = vpop.f32.mrf.mxu0  ;;  %v1718_v53 = vpop.f32.mrf.mxu1  ;;  %v642_v54 = vsel %vm440_vm3, %v634_v51, -inf }
 0x269   : > { %643 = vmax.xlane.f32.xlu0 %v642_v54 }
 0x26a   : > { %v576_v55 = vpop.f32.mrf.mxu1  ;;  %v619_v56 = vpop.f32.mrf.mxu0 }
 0x26b   : > { %v635_v57 = vsel %vm629_vm5, -1e+30, %v619_v56 }
 0x26c   : > { %v1719_v58 = vpop.f32.mrf.mxu1  ;;  %v1724_v59 = vpop.f32.mrf.mxu0  ;;  %v645_v60 = vsel %vm440_vm3, %v635_v57, -inf }
 0x26d   : > { %646 = vmax.xlane.f32.xlu1 %v645_v60 }
 0x26e   : > { %v622_v61 = vpop.f32.mrf.mxu0 }
 0x270   : > { %v1725_v62 = vpop.f32.mrf.mxu0 }
 0x27e   : > { %404 = vrot.lane.b32.xlu1 %v2245_v8, %s2061_s11  ;;  %s2066_s11 = smov [#allocation12]  }
 0x27f   : > { %422 = vrot.lane.b32.xlu0 %v2245_v8, %s2062_s10  ;;  %s1963_s10 = sshll.u32 %s2066_s11, 4  ;;  %s1964_s10 = int_to_ptr.vmem [resolvable:$false] %s1963_s10 }
 0x280   : > { %p1966_p2 = scmp.lt.s32.totalorder %s2333_s17, %s1964_s10 }
 0x2ea   : > { %v638_v63 = vpop.xlane.xlu1 %637 }
 0x2eb   : > { %v648_v1 = vsub.f32 %v632_v40, %v638_v63 }
 0x2ed   : > { %v652_v2 = vmul.f32 1.442695, %v648_v1 }
 0x2ee   : > { %v641_v3 = vpop.xlane.xlu0 %640 }
 0x2ef   : > { %1863 = vpow2.f32 %v652_v2  ;;  %v649_v4 = vsub.f32 %v633_v45, %v641_v3 }
 0x2f1   : > { %v654_v5 = vmul.f32 1.442695, %v649_v4  ;;  %v1658_v4 = vld [vmem:[%s2384_s4] ss:$0 sm:$0xff] }
 0x2f2   : > { %v644_v6 = vpop.xlane.xlu0 %643 }
 0x2f3   : > { %1865 = vpow2.f32 %v654_v5  ;;  %v650_v7 = vsub.f32 %v634_v51, %v644_v6 }
 0x2f5   : > { %v656_v9 = vmul.f32 1.442695, %v650_v7 }
 0x2f6   : > { %v423_v10 = vpop.permute.xlu0 %422  ;;  %v647_v11 = vpop.xlane.xlu1 %646 }
 0x2f7   : > { %1867 = vpow2.f32 %v656_v9  ;;  %1635 = vst.msk [vmem:[#allocation3 + $0xc] sm:$0xf] %vm356_vm2, %v423_v10  ;;  %v651_v12 = vsub.f32 %v635_v57, %v647_v11 }
 0x2f9   : > { %v658_v13 = vmul.f32 1.442695, %v651_v12 }
 0x2fa   : > { %v405_v14 = vpop.permute.xlu1 %404 }
 0x2fb   : > { %1869 = vpow2.f32 %v658_v13  ;;  %1633 = vst.msk [vmem:[#allocation3 + $0x8] sm:$0xf] %vm356_vm2, %v405_v14 }
 0x2fc   : > { %v1864_v8 = vpop.eup %1863 }
 0x2fd   : > { %v672_v15 = vpack.c.bf16 %v1864_v8, %v1864_v8  ;;  %v660_v25 = vsel %vm440_vm3, %v1864_v8, 0.0 }
 0x2fe   : > { %v439_v17 = vld [vmem:[#allocation3 + $0xc] sm:$0xf] }
 0x2ff   : > { %1729 = vmatmul.mubr.msk.bf16.vlgmr.msra.gmra.mxu1 %vm440_vm3, %v672_v15  ;;  %v819_v21 = vsel %vm679_vm4, %v439_v17, 0 }
 0x300   : > { %v1866_v16 = vpop.eup %1865  ;;  %1740 = vmatprep.mubr.msk.bf16.mxu1 %vm2051_vm0, %v2050_v0 }
 0x301   : > { %v663_v18 = vsel %vm440_vm3, %v1866_v16, 0.0  ;;  %v673_v19 = vpack.c.bf16 %v1866_v16, %v1866_v16 }
 0x302   : > { %664 = vadd.xlane.f32.xlu1 %v663_v18  ;;  %v438_v20 = vld [vmem:[#allocation3 + $0x8] sm:$0xf] }
 0x303   : > { %1735 = vmatmul.mubr.msk.bf16.vlgmr.msra.gmra.mxu0 %vm440_vm3, %v673_v19  ;;  %v773_v22 = vsel %vm679_vm4, %v438_v20, 0 }
 0x304   : > { %v1868_v23 = vpop.eup %1867  ;;  %1745 = vmatpush3.bf16.msra.mxu0 %v819_v21  ;;  %1739 = vmatpush3.bf16.msra.mxu1 %v773_v22 }
 0x305   : > { %v666_v24 = vsel %vm440_vm3, %v1868_v23, 0.0  ;;  %v674_v26 = vpack.c.bf16 %v1868_v23, %v1868_v23  ;;  %1746 = vmatprep.mubr.msk.bf16.mxu0 %vm2051_vm0, %v2050_v0  ;;  %1750 = vmatprep.subr.bf16.mxu1 %v2050_v0 }
 0x306   : > { %667 = vadd.xlane.f32.xlu0 %v666_v24  ;;  %661 = vadd.xlane.f32.xlu1 %v660_v25 }
 0x307   : > { %1741 = vmatmul.mubr.msk.bf16.vlgmr.msra.gmra.mxu1 %vm440_vm3, %v674_v26 }
 0x308   : > { %v1870_v27 = vpop.eup %1869  ;;  %1754 = vmatprep.mubr.msk.bf16.mxu1 %vm2051_vm0, %v2050_v0  ;;  %1751 = vmatpush3.bf16.msra.mxu1 %v1861_v42 }
 0x309   : > { %v669_v28 = vsel %vm440_vm3, %v1870_v27, 0.0  ;;  %v675_v29 = vpack.c.bf16 %v1870_v27, %v1870_v27  ;;  %1752 = vmatprep.subr.bf16.mxu1 %v2050_v0 }
 0x30a   : > { %670 = vadd.xlane.f32.xlu0 %v669_v28 }
 0x30b   : > { %1747 = vmatmul.mubr.msk.bf16.vlgmr.msra.gmra.mxu0 %vm440_vm3, %v675_v29 }
 0x30c   : > { %1753 = vmatpush3.bf16.msra.mxu1 %v1862_v46 }
 0x38b   : > { %v665_v30 = vpop.xlane.xlu1 %664 }
 0x38f   : > { %v662_v31 = vpop.xlane.xlu1 %661  ;;  %v668_v32 = vpop.xlane.xlu0 %667 }
 0x390   : > { %1871 = vrcp.f32 %v662_v31 }
 0x391   : > { %1873 = vrcp.f32 %v665_v30 }
 0x392   : > { %1875 = vrcp.f32 %v668_v32 }
 0x393   : > { %v671_v33 = vpop.xlane.xlu0 %670 }
 0x394   : > { %1877 = vrcp.f32 %v671_v33 }
 0x39d   : > { %v1872_v34 = vpop.eup %1871 }
 0x39e   : > { %v1874_v39 = vpop.eup %1873 }
 0x39f   : > { %v1876_v48 = vpop.eup %1875 }
 0x3a1   : > { %v1878_v55 = vpop.eup %1877 }
 0x3bf   : > { %v717_v35 = vpop.f32.mrf.mxu1 }
 0x3c0   : > { %v1324_v36 = vmul.f32 %v1872_v34, %v717_v35 }
 0x3c1   : > { %v1730_v37 = vpop.f32.mrf.mxu1 }
 0x3c2   : > { %v1328_v38 = vpack.c.bf16 %v1324_v36, %v1324_v36 }
 0x3c3   : > { %v720_v40 = vpop.f32.mrf.mxu1  ;;  %v763_v41 = vpop.f32.mrf.mxu0 }
 0x3c4   : > { %1329 = vst.msk [vmem:[#allocation5] sm:$0xf] %vm356_vm2, %v1328_v38  ;;  %v1325_v43 = vmul.f32 %v1874_v39, %v763_v41 }
 0x3c5   : > { %v1731_v44 = vpop.f32.mrf.mxu1  ;;  %v1736_v45 = vpop.f32.mrf.mxu0 }
 0x3c6   : > { %v1669_v47 = vpack.c.bf16 %v1325_v43, %v1325_v43 }
 0x3c7   : > { %v766_v49 = vpop.f32.mrf.mxu0  ;;  %v809_v50 = vpop.f32.mrf.mxu1 }
 0x3c8   : > { %v1326_v51 = vmul.f32 %v1876_v48, %v809_v50  ;;  %1334 = vrot.lane.b32.xlu0 %v1669_v47, %s2063_s13  ;;  %s1965_s13 = scalar_lea.vmem %s1964_s10, 256 }
 0x3c9   : > { %v1737_v52 = vpop.f32.mrf.mxu0  ;;  %v1742_v53 = vpop.f32.mrf.mxu1  ;;  %p1967_p13 = scmp.lt.s32.totalorder %s1965_s13, %s1959_s21 }
 0x3ca   : > { %v1670_v54 = vpack.c.bf16 %v1326_v51, %v1326_v51 }
 0x3cb   : > { %v812_v56 = vpop.f32.mrf.mxu1  ;;  %v855_v57 = vpop.f32.mrf.mxu0  ;;  %p1968_p0 = por %p1967_p13, %p1966_p2 }
 0x3cc   : > { %v1327_v58 = vmul.f32 %v1878_v55, %v855_v57  ;;  %1343 = vrot.lane.b32.xlu1 %v1670_v54, %s2064_s14 }
 0x3cd   : > { %v1743_v59 = vpop.f32.mrf.mxu1  ;;  %v1748_v60 = vpop.f32.mrf.mxu0  ;;  %p1969_p5 = pnand %p1968_p0, %p1962_p11 }
 0x3ce   : > { %v1671_v61 = vpack.c.bf16 %v1327_v58, %v1327_v58 }
 0x3cf   : > { %v858_v0 = vpop.f32.mrf.mxu0 }
 0x3d0   : > { %1352 = vrot.lane.b32.xlu1 %v1671_v61, %s2065_s1 }
 0x3d1   : > { %v1749_v62 = vpop.f32.mrf.mxu0 }
 0x43a   : > { %v1335_v63 = vpop.permute.xlu0 %1334 }
 0x43b   : > { %1338 = vst.msk [vmem:[#allocation5] sm:$0xf] %vm1337_vm6, %v1335_v63 }
 0x43e   : > { %v1344_v1 = vpop.permute.xlu1 %1343 }
 0x43f   : > { %1347 = vst.msk [vmem:[#allocation5] sm:$0xf] %vm1346_vm7, %v1344_v1 }
 0x442   : > { %v1353_v2 = vpop.permute.xlu1 %1352 }
 0x443   : > { %1356 = vst.msk [vmem:[#allocation5] sm:$0xf] %vm1355_vm8, %v1353_v2 }
 0x44a   : > { %v1357_v3 = vld [vmem:[#allocation5] sm:$0xf] }
 0x44b   : > { %1755 = vmatmul.mubr.msk.bf16.vlgmr.msra.gmra.mxu1 %vm311_vm1, %v1357_v3 }
 0x50b   : > { %v1418_v5 = vpop.f32.mrf.mxu1 }
 0x50c   : > { %v1419_v6 = vadd.f32 %v1658_v4, %v1418_v5 }
 0x50d   : > { %v1756_v7 = vpop.f32.mrf.mxu1 }
 0x50e   : > { %1424 = vst.msk [vmem:[%s285_s16] sm:$0xff] %vm311_vm1, %v1419_v6 }
 0x50f   : > { %v1421_v9 = vpop.f32.mrf.mxu1 }
 0x510   : > { %1972 = shalt.err (!%p1969_p5)
}
 0x511   : > { %s1973_s14 = scalar_lea.hbm %s2331_s8, 128  ;;  %s1977_s26 = scalar_lea.hbm %s2385_s5, 256 }
 0x512   : > { %p1974_p10 = scmp.ne.s32.totalorder %s2331_s8, %s1973_s14  ;;  %p1978_p6 = scmp.lt.s32.totalorder %s2331_s8, %s2385_s5 }
 0x513   : > { %p1979_p12 = scmp.lt.s32.totalorder %s1977_s26, %s1973_s14 }
 0x514   : > { %p1975_p1 = pnand %p1974_p10, %p2192_p7 }
 0x515   : > { %p1980_p3 = por %p1979_p12, %p1978_p6 }
 0x516   : > { %p1976_p4 = pneg %p1975_p1 }
 0x518   : > { %p1981_p8 = pnand %p1980_p3, %p1976_p4 }
 0x51a   : > { %1984 = shalt.err (!%p1981_p8)
}
 0x51b   : > { %1768 = dma.vmem_to_hbm [thread:$0]  (%p2192_p7), %s2333_s17, 128, %s2331_s8, %s1426_s6   ;;  %v1757_v10 = vpop.f32.mrf.mxu1 }
 0x51c PF: > { %s1452_s15 = sand.u32 1, %s2023_s18   ;;  %p2401_p9 = scmp.ne.s32.totalorder %s2393_s29, 0 }
 0x51d   : > { %p2402_p11 = scmp.ge.s32.totalorder %s2043_s23, 2  ;;  %s1453_s16 = scalar_lea.sflag [#allocation8], %s1452_s15 }
 0x51f   : > { %p1782_p2 = pnand %p2402_p11, %p2401_p9 }
 0x521   : > { %p1783_p13 = pneg %p1782_p2 }
 0x523   : > { %2018 = dma.done.wait (%p1783_p13), %s1453_s16, 128  }
 0x524   : > { %2020 = vsyncadd (%p1783_p13), %s1453_s16, 4294967168  ;;  %s22_s23 = sadd.s32 1, %s2043_s23   ;;  %s2403_s18 = smov %s2027_s19 }
 0x525   : > { %p19_p0 = scmp.ge.s32.totalorder %s22_s23, 4   ;;  %s2404_s19 = smov %s2031_s20 }
 0x526   : > { %s2405_s20 = smov %s2201_s12  ;;  %s2406_s21 = smov %s2039_s22 }
 0x527   : > { %s2407_s22 = smov %s2409_s25  ;;  %21 = sbr.rel (!%p19_p0) target bundleno = 9 (0x9), region = 124 }
 0x52c   :  { %1458 = vsyncpa [#allocation7], 1 }
 0x52d   :  { %1460 = vsyncpa [#allocation7 + $0x1], 1 }
 0x52e   :  { %1461 = vsyncpa [#allocation10], 1 }
 0x52f   :  { %1462 = vsyncpa [#allocation8], 1 }
 0x530   :  { %1464 = vsyncpa [#allocation8 + $0x1], 1 }

</bundles_post_ra>
